<compile_context>
chip_gen: v7x
topology: tpu7x:2x2x1
jax: 0.10.0
libtpu: 0.0.40
codegen_flags: <defaults>
</compile_context>

<pallas_src>
import functools

import jax
import jax.numpy as jnp
from jax.experimental import pallas as pl
from jax.experimental.pallas import tpu as pltpu

BN_EPS = 1e-5


def _round_up(x, m):
    return -(-x // m) * m


# --------------------------- fused forward kernel -------------------------- #
def gnn_fused_kernel(w_bd_ref, h0_ref, pool_ref, feat_ref, wf_ref, params_ref,
                     out_ref, *, mat_offsets, vec_base, vec_rows, vec_idx,
                     residual_flags, num_classes):
    """Single grid-less invocation; everything stays VMEM-resident.

    w_bd_ref   [BN, BN]  block-diag edge weights, mean-agg (1/deg) pre-folded
    h0_ref     [BN, Fin] flattened node features (Fin padded to mult. of 8)
    pool_ref   [B, BN]   per-graph mean-pooling matrix (dgl.mean_nodes)
    feat_ref   [B, KP]   zero-padded graph-level features (bf16)
    wf_ref     [KP, H]   fc_feature weight (bf16)
    params_ref [R, H]    packed f32 slab: weight matrices at 8-aligned row
                         offsets + trailing block of row vectors (biases,
                         BN gamma/beta)
    out_ref    [B, C]
    """
    w_bd = w_bd_ref[...]            # reused by all three layers
    h = h0_ref[...]                 # [BN, Fin]

    def mat(name):
        r0, nr = mat_offsets[name]
        return params_ref[r0:r0 + nr, :]          # static, 8-aligned ref slice

    # All row vectors live in one 8-aligned block: load once, slice the value.
    vecs = params_ref[vec_base:vec_base + vec_rows, :]

    def vec(name):
        i = vec_idx[name]
        return vecs[i:i + 1, :]                   # [1, H], broadcasts over rows

    for i, residual in enumerate(residual_flags):
        # message passing with mean aggregation (deg_inv folded into w_bd);
        # DGL's update_all overwrites ndata['h'] with this aggregate, so the
        # residual below correctly adds `agg`, not the layer input.
        agg = jnp.dot(w_bd, h, preferred_element_type=jnp.float32)     # [BN,F]
        h1 = jnp.maximum(
            jnp.dot(agg, mat(f"w1_{i}"), preferred_element_type=jnp.float32)
            + vec(f"b1_{i}"), 0.0)
        h2 = jnp.maximum(
            jnp.dot(h1, mat(f"w2_{i}"), preferred_element_type=jnp.float32)
            + vec(f"b2_{i}"), 0.0)
        # BatchNorm1d: training-mode batch statistics over all B*N nodes,
        # single-pass var = E[x^2] - E[x]^2 (all in f32).
        # TODO(synk): eval-mode BatchNorm1d would use running statistics.
        mean = jnp.mean(h2, axis=0, keepdims=True)
        var = jnp.maximum(
            jnp.mean(h2 * h2, axis=0, keepdims=True) - mean * mean, 0.0)
        hbn = (h2 - mean) * jax.lax.rsqrt(var + BN_EPS)
        hbn = hbn * vec(f"gamma_{i}") + vec(f"beta_{i}")
        if residual:
            hbn = hbn + agg
        h = hbn
    # TODO(synk): nn.Dropout(0.5) treated as identity (eval-mode forward).

    # readout: dgl.mean_nodes as a pooling matmul -> [B, H]
    h_agg = jnp.dot(pool_ref[...], h, preferred_element_type=jnp.float32)

    # feature branch: bf16 x bf16 MXU matmul, f32 accumulation
    f_out = jnp.maximum(
        jnp.dot(feat_ref[...], wf_ref[...], preferred_element_type=jnp.float32)
        + vec("bf"), 0.0)

    # torch.cat((h_agg, features_out),1) @ Wc == h_agg@Wc[:H] + f_out@Wc[H:]
    comb = jnp.maximum(
        jnp.dot(h_agg, mat("wc1"), preferred_element_type=jnp.float32)
        + jnp.dot(f_out, mat("wc2"), preferred_element_type=jnp.float32)
        + vec("bc"), 0.0)
    out_full = (jnp.dot(comb, mat("wfc"), preferred_element_type=jnp.float32)
                + vec("bfc"))                     # [B, H] (cols >= C are zero)
    out_ref[...] = out_full[:, :num_classes].astype(out_ref.dtype)


# --------------------------- host-side packing ------------------------------ #
def pack_params(layer_params_list, bf, wc1, wc2, bc, wfc, bfc, hidden,
                num_classes):
    """Concatenate every small parameter into ONE [R, hidden] f32 slab.

    Matrix sections start at 8-aligned row offsets (sublane aligned, so the
    in-kernel ref slices are zero-cost); all [1, hidden] row vectors are
    stacked into a single trailing block.
    """
    del num_classes  # wfc/bfc are zero-padded to `hidden` lanes below
    blocks, mat_offsets, row = [], {}, 0

    def add_mat(name, m):
        nonlocal row
        rp = _round_up(m.shape[0], 8)
        mp = jnp.zeros((rp, hidden), jnp.float32).at[:m.shape[0],
                                                     :m.shape[1]].set(m)
        mat_offsets[name] = (row, rp)
        blocks.append(mp)
        row += rp

    vec_names, vec_vals = [], []

    def add_vec(name, v):
        v = v.reshape(-1)
        vec_names.append(name)
        vec_vals.append(jnp.zeros((hidden,), jnp.float32).at[:v.size].set(v))

    for i, p in enumerate(layer_params_list):
        add_mat(f"w1_{i}", p["w1"])
        add_mat(f"w2_{i}", p["w2"])
        add_vec(f"b1_{i}", p["b1"])
        add_vec(f"b2_{i}", p["b2"])
        add_vec(f"gamma_{i}", p["gamma"])
        add_vec(f"beta_{i}", p["beta"])
    add_mat("wc1", wc1)
    add_mat("wc2", wc2)
    add_mat("wfc", wfc)            # [hidden, num_classes] -> cols zero-padded
    add_vec("bf", bf)
    add_vec("bc", bc)
    add_vec("bfc", bfc)            # zero-padded to `hidden` lanes

    vec_base = row
    nvec = len(vec_vals)
    vec_rows = _round_up(nvec, 8)
    vblock = jnp.zeros((vec_rows, hidden), jnp.float32).at[:nvec].set(
        jnp.stack(vec_vals))
    blocks.append(vblock)
    slab = jnp.concatenate(blocks, axis=0)
    vec_idx = {n: i for i, n in enumerate(vec_names)}
    return slab, mat_offsets, vec_base, vec_rows, vec_idx


def gnn_forward(w_bd, h0_flat, pool, feat_bf16, wf_bf16, param_slab,
                mat_offsets, vec_base, vec_rows, vec_idx, residual_flags,
                num_classes):
    B = pool.shape[0]
    vmem = pl.BlockSpec(memory_space=pltpu.MemorySpace.VMEM)
    kernel = functools.partial(
        gnn_fused_kernel,
        mat_offsets=mat_offsets, vec_base=vec_base, vec_rows=vec_rows,
        vec_idx=vec_idx, residual_flags=tuple(residual_flags),
        num_classes=num_classes)
    return pl.pallas_call(
        kernel,
        out_shape=jax.ShapeDtypeStruct((B, num_classes), jnp.float32),
        in_specs=[vmem] * 6,
        out_specs=vmem,
    )(w_bd, h0_flat, pool, feat_bf16, wf_bf16, param_slab)


# ------------------------- deterministic params ----------------------------- #
def init_linear(key, fan_in, fan_out):
    kw, kb = jax.random.split(key)
    bound = 1.0 / float(fan_in) ** 0.5
    w = jax.random.uniform(kw, (fan_in, fan_out), jnp.float32, -bound, bound)
    b = jax.random.uniform(kb, (fan_out,), jnp.float32, -bound, bound)
    return w, b


def layer_params(key, f_in, f_out):
    k1, k2 = jax.random.split(key)
    w1, b1 = init_linear(k1, f_in, f_out)
    w2, b2 = init_linear(k2, f_out, f_out)
    return dict(w1=w1, b1=b1.reshape(1, f_out),
                w2=w2, b2=b2.reshape(1, f_out),
                gamma=jnp.ones((1, f_out), jnp.float32),
                beta=jnp.zeros((1, f_out), jnp.float32))


if __name__ == "__main__":
    B, N = 2, 8                       # 2 graphs, 8 nodes each
    in_feats, hidden, num_classes = 16, 32, 4
    feature_size = 1197

    key = jax.random.PRNGKey(0)
    keys = jax.random.split(key, 10)

    # deterministic random graph: dense edge weights, self-loops so deg_in >= 1
    mask = (jax.random.uniform(keys[0], (B, N, N)) < 0.5).astype(jnp.float32)
    mask = jnp.maximum(mask, jnp.eye(N, dtype=jnp.float32)[None])
    e_w = jax.random.uniform(keys[1], (B, N, N), jnp.float32, 0.1, 1.0)
    w_dense = mask * e_w                                   # [B, N_dst, N_src]
    deg = jnp.sum(mask, axis=2, keepdims=True)             # in-degree [B, N, 1]
    deg_inv = jnp.where(deg > 0, 1.0 / deg, 0.0)

    # Fold mean-aggregation (deg_inv) into the edge weights once, then build a
    # block-diagonal [B*N, B*N] operator so message passing is one 2D matmul.
    w_scaled = w_dense * deg_inv
    w_bd = jax.scipy.linalg.block_diag(*[w_scaled[b] for b in range(B)])

    # per-graph mean-pooling matrix for dgl.mean_nodes: [B, B*N]
    pool = jnp.kron(jnp.eye(B, dtype=jnp.float32),
                    jnp.full((1, N), 1.0 / N, jnp.float32))

    h0 = jax.random.normal(keys[2], (B, N, in_feats), jnp.float32)
    in_pad = _round_up(in_feats, 8)                         # sublane alignment
    h0_flat = jnp.zeros((B * N, in_pad), jnp.float32).at[:, :in_feats].set(
        h0.reshape(B * N, in_feats))
    features = jax.random.normal(keys[3], (B, feature_size), jnp.float32)

    p1 = layer_params(keys[4], in_feats, hidden)
    p2 = layer_params(keys[5], hidden, hidden)
    p3 = layer_params(keys[6], hidden, hidden)

    wf, bf = init_linear(keys[7], feature_size, hidden)     # fc_feature
    wc, bc = init_linear(keys[8], 2 * hidden, hidden)       # fc_combine
    wc1, wc2 = wc[:hidden], wc[hidden:]
    wfc, bfc = init_linear(keys[9], hidden, num_classes)    # fc

    # pad the feature contraction dim 1197 -> 1280 (multiple of 128); padded
    # rows/cols are zero so the math is unchanged.  Stored in bf16 to halve the
    # only sizable HBM transfer; the dot accumulates in f32.
    kp = _round_up(feature_size, 128)
    feat_pad = jnp.zeros((B, kp), jnp.float32).at[:, :feature_size].set(features)
    wf_pad = jnp.zeros((kp, hidden), jnp.float32).at[:feature_size, :].set(wf)
    feat_bf16 = feat_pad.astype(jnp.bfloat16)
    wf_bf16 = wf_pad.astype(jnp.bfloat16)

    # pack every small parameter into one aligned slab (one prologue DMA)
    param_slab, mat_offsets, vec_base, vec_rows, vec_idx = pack_params(
        [p1, p2, p3], bf, wc1, wc2, bc, wfc, bfc, hidden, num_classes)

    out = gnn_forward(
        w_bd, h0_flat, pool, feat_bf16, wf_bf16, param_slab,
        mat_offsets, vec_base, vec_rows, vec_idx,
        residual_flags=(in_feats == hidden, True, True),
        num_classes=num_classes)

    jax.block_until_ready(out)
    assert out.shape == (B, num_classes) and out.dtype == jnp.float32
    print("KERNEL_OK")
</pallas_src>

<mosaic_0001>
module attributes {stable_mosaic.version = 11 : i64} {
  func.func @gnn_fused_kernel(%arg0: memref<16x16xf32, #tpu.memory_space<vmem>>, %arg1: memref<16x16xf32, #tpu.memory_space<vmem>>, %arg2: memref<2x16xf32, #tpu.memory_space<vmem>>, %arg3: memref<2x1280xbf16, #tpu.memory_space<vmem>>, %arg4: memref<1280x32xbf16, #tpu.memory_space<vmem>>, %arg5: memref<288x32xf32, #tpu.memory_space<vmem>>, %arg6: memref<2x4xf32, #tpu.memory_space<vmem>>) attributes {dimension_semantics = [], scalar_prefetch = 0 : i64, scratch_operands = 0 : i64, tpu.core_type = #tpu.core_type<tc>} {
    %c0 = arith.constant 0 : index
    %c0_0 = arith.constant 0 : index
    %0 = vector.load %arg0[%c0, %c0_0] : memref<16x16xf32, #tpu.memory_space<vmem>>, vector<16x16xf32>
    %c0_1 = arith.constant 0 : index
    %c0_2 = arith.constant 0 : index
    %1 = vector.load %arg1[%c0_1, %c0_2] : memref<16x16xf32, #tpu.memory_space<vmem>>, vector<16x16xf32>
    %c272 = arith.constant 272 : index
    %c0_3 = arith.constant 0 : index
    %2 = vector.load %arg5[%c272, %c0_3] : memref<288x32xf32, #tpu.memory_space<vmem>>, vector<16x32xf32>
    %cst = arith.constant dense<0.000000e+00> : vector<16x16xf32>
    %3 = tpu.matmul %0, %1, %cst {dimension_numbers = #tpu.dot_dimension_numbers<[1], [0], [0], [1], [0, 0, 1, 1], [], []>} : vector<16x16xf32>, vector<16x16xf32>, vector<16x16xf32> -> vector<16x16xf32>
    %c0_4 = arith.constant 0 : index
    %c0_5 = arith.constant 0 : index
    %4 = vector.load %arg5[%c0_4, %c0_5] : memref<288x32xf32, #tpu.memory_space<vmem>>, vector<16x32xf32>
    %cst_6 = arith.constant dense<0.000000e+00> : vector<16x32xf32>
    %5 = tpu.matmul %3, %4, %cst_6 {dimension_numbers = #tpu.dot_dimension_numbers<[1], [0], [0], [1], [0, 0, 1, 1], [], []>} : vector<16x16xf32>, vector<16x32xf32>, vector<16x32xf32> -> vector<16x32xf32>
    %6 = vector.extract_strided_slice %2 {offsets = [0, 0], sizes = [1, 32], strides = [1, 1]} : vector<16x32xf32> to vector<1x32xf32>
    %7 = vector.broadcast %6 : vector<1x32xf32> to vector<16x32xf32>
    %8 = arith.addf %5, %7 : vector<16x32xf32>
    %cst_7 = arith.constant 0.000000e+00 : f32
    %9 = vector.broadcast %cst_7 : f32 to vector<16x32xf32>
    %10 = arith.maximumf %8, %9 : vector<16x32xf32>
    %c16 = arith.constant 16 : index
    %c0_8 = arith.constant 0 : index
    %11 = vector.load %arg5[%c16, %c0_8] : memref<288x32xf32, #tpu.memory_space<vmem>>, vector<32x32xf32>
    %cst_9 = arith.constant dense<0.000000e+00> : vector<16x32xf32>
    %12 = tpu.matmul %10, %11, %cst_9 {dimension_numbers = #tpu.dot_dimension_numbers<[1], [0], [0], [1], [0, 0, 1, 1], [], []>} : vector<16x32xf32>, vector<32x32xf32>, vector<16x32xf32> -> vector<16x32xf32>
    %13 = vector.extract_strided_slice %2 {offsets = [1, 0], sizes = [1, 32], strides = [1, 1]} : vector<16x32xf32> to vector<1x32xf32>
    %14 = vector.broadcast %13 : vector<1x32xf32> to vector<16x32xf32>
    %15 = arith.addf %12, %14 : vector<16x32xf32>
    %cst_10 = arith.constant 0.000000e+00 : f32
    %16 = vector.broadcast %cst_10 : f32 to vector<16x32xf32>
    %17 = arith.maximumf %15, %16 : vector<16x32xf32>
    %cst_11 = arith.constant dense<0.000000e+00> : vector<32xf32>
    %18 = vector.multi_reduction <add>, %17, %cst_11 [0] : vector<16x32xf32> to vector<32xf32>
    %19 = vector.shape_cast %18 : vector<32xf32> to vector<1x32xf32>
    %cst_12 = arith.constant 1.600000e+01 : f32
    %20 = vector.broadcast %cst_12 : f32 to vector<1x32xf32>
    %21 = arith.divf %19, %20 : vector<1x32xf32>
    %22 = arith.mulf %17, %17 : vector<16x32xf32>
    %cst_13 = arith.constant dense<0.000000e+00> : vector<32xf32>
    %23 = vector.multi_reduction <add>, %22, %cst_13 [0] : vector<16x32xf32> to vector<32xf32>
    %24 = vector.shape_cast %23 : vector<32xf32> to vector<1x32xf32>
    %cst_14 = arith.constant 1.600000e+01 : f32
    %25 = vector.broadcast %cst_14 : f32 to vector<1x32xf32>
    %26 = arith.divf %24, %25 : vector<1x32xf32>
    %27 = arith.mulf %21, %21 : vector<1x32xf32>
    %28 = arith.subf %26, %27 : vector<1x32xf32>
    %cst_15 = arith.constant 0.000000e+00 : f32
    %29 = vector.broadcast %cst_15 : f32 to vector<1x32xf32>
    %30 = arith.maximumf %28, %29 : vector<1x32xf32>
    %31 = vector.broadcast %21 : vector<1x32xf32> to vector<16x32xf32>
    %32 = arith.subf %17, %31 : vector<16x32xf32>
    %cst_16 = arith.constant 9.99999974E-6 : f32
    %33 = vector.broadcast %cst_16 : f32 to vector<1x32xf32>
    %34 = arith.addf %30, %33 : vector<1x32xf32>
    %35 = math.rsqrt %34 : vector<1x32xf32>
    %36 = vector.broadcast %35 : vector<1x32xf32> to vector<16x32xf32>
    %37 = arith.mulf %32, %36 : vector<16x32xf32>
    %38 = vector.extract_strided_slice %2 {offsets = [2, 0], sizes = [1, 32], strides = [1, 1]} : vector<16x32xf32> to vector<1x32xf32>
    %39 = vector.broadcast %38 : vector<1x32xf32> to vector<16x32xf32>
    %40 = arith.mulf %37, %39 : vector<16x32xf32>
    %41 = vector.extract_strided_slice %2 {offsets = [3, 0], sizes = [1, 32], strides = [1, 1]} : vector<16x32xf32> to vector<1x32xf32>
    %42 = vector.broadcast %41 : vector<1x32xf32> to vector<16x32xf32>
    %43 = arith.addf %40, %42 : vector<16x32xf32>
    %cst_17 = arith.constant dense<0.000000e+00> : vector<16x32xf32>
    %44 = tpu.matmul %0, %43, %cst_17 {dimension_numbers = #tpu.dot_dimension_numbers<[1], [0], [0], [1], [0, 0, 1, 1], [], []>} : vector<16x16xf32>, vector<16x32xf32>, vector<16x32xf32> -> vector<16x32xf32>
    %c48 = arith.constant 48 : index
    %c0_18 = arith.constant 0 : index
    %45 = vector.load %arg5[%c48, %c0_18] : memref<288x32xf32, #tpu.memory_space<vmem>>, vector<32x32xf32>
    %cst_19 = arith.constant dense<0.000000e+00> : vector<16x32xf32>
    %46 = tpu.matmul %44, %45, %cst_19 {dimension_numbers = #tpu.dot_dimension_numbers<[1], [0], [0], [1], [0, 0, 1, 1], [], []>} : vector<16x32xf32>, vector<32x32xf32>, vector<16x32xf32> -> vector<16x32xf32>
    %47 = vector.extract_strided_slice %2 {offsets = [4, 0], sizes = [1, 32], strides = [1, 1]} : vector<16x32xf32> to vector<1x32xf32>
    %48 = vector.broadcast %47 : vector<1x32xf32> to vector<16x32xf32>
    %49 = arith.addf %46, %48 : vector<16x32xf32>
    %cst_20 = arith.constant 0.000000e+00 : f32
    %50 = vector.broadcast %cst_20 : f32 to vector<16x32xf32>
    %51 = arith.maximumf %49, %50 : vector<16x32xf32>
    %c80 = arith.constant 80 : index
    %c0_21 = arith.constant 0 : index
    %52 = vector.load %arg5[%c80, %c0_21] : memref<288x32xf32, #tpu.memory_space<vmem>>, vector<32x32xf32>
    %cst_22 = arith.constant dense<0.000000e+00> : vector<16x32xf32>
    %53 = tpu.matmul %51, %52, %cst_22 {dimension_numbers = #tpu.dot_dimension_numbers<[1], [0], [0], [1], [0, 0, 1, 1], [], []>} : vector<16x32xf32>, vector<32x32xf32>, vector<16x32xf32> -> vector<16x32xf32>
    %54 = vector.extract_strided_slice %2 {offsets = [5, 0], sizes = [1, 32], strides = [1, 1]} : vector<16x32xf32> to vector<1x32xf32>
    %55 = vector.broadcast %54 : vector<1x32xf32> to vector<16x32xf32>
    %56 = arith.addf %53, %55 : vector<16x32xf32>
    %cst_23 = arith.constant 0.000000e+00 : f32
    %57 = vector.broadcast %cst_23 : f32 to vector<16x32xf32>
    %58 = arith.maximumf %56, %57 : vector<16x32xf32>
    %cst_24 = arith.constant dense<0.000000e+00> : vector<32xf32>
    %59 = vector.multi_reduction <add>, %58, %cst_24 [0] : vector<16x32xf32> to vector<32xf32>
    %60 = vector.shape_cast %59 : vector<32xf32> to vector<1x32xf32>
    %cst_25 = arith.constant 1.600000e+01 : f32
    %61 = vector.broadcast %cst_25 : f32 to vector<1x32xf32>
    %62 = arith.divf %60, %61 : vector<1x32xf32>
    %63 = arith.mulf %58, %58 : vector<16x32xf32>
    %cst_26 = arith.constant dense<0.000000e+00> : vector<32xf32>
    %64 = vector.multi_reduction <add>, %63, %cst_26 [0] : vector<16x32xf32> to vector<32xf32>
    %65 = vector.shape_cast %64 : vector<32xf32> to vector<1x32xf32>
    %cst_27 = arith.constant 1.600000e+01 : f32
    %66 = vector.broadcast %cst_27 : f32 to vector<1x32xf32>
    %67 = arith.divf %65, %66 : vector<1x32xf32>
    %68 = arith.mulf %62, %62 : vector<1x32xf32>
    %69 = arith.subf %67, %68 : vector<1x32xf32>
    %cst_28 = arith.constant 0.000000e+00 : f32
    %70 = vector.broadcast %cst_28 : f32 to vector<1x32xf32>
    %71 = arith.maximumf %69, %70 : vector<1x32xf32>
    %72 = vector.broadcast %62 : vector<1x32xf32> to vector<16x32xf32>
    %73 = arith.subf %58, %72 : vector<16x32xf32>
    %cst_29 = arith.constant 9.99999974E-6 : f32
    %74 = vector.broadcast %cst_29 : f32 to vector<1x32xf32>
    %75 = arith.addf %71, %74 : vector<1x32xf32>
    %76 = math.rsqrt %75 : vector<1x32xf32>
    %77 = vector.broadcast %76 : vector<1x32xf32> to vector<16x32xf32>
    %78 = arith.mulf %73, %77 : vector<16x32xf32>
    %79 = vector.extract_strided_slice %2 {offsets = [6, 0], sizes = [1, 32], strides = [1, 1]} : vector<16x32xf32> to vector<1x32xf32>
    %80 = vector.broadcast %79 : vector<1x32xf32> to vector<16x32xf32>
    %81 = arith.mulf %78, %80 : vector<16x32xf32>
    %82 = vector.extract_strided_slice %2 {offsets = [7, 0], sizes = [1, 32], strides = [1, 1]} : vector<16x32xf32> to vector<1x32xf32>
    %83 = vector.broadcast %82 : vector<1x32xf32> to vector<16x32xf32>
    %84 = arith.addf %81, %83 : vector<16x32xf32>
    %85 = arith.addf %84, %44 : vector<16x32xf32>
    %cst_30 = arith.constant dense<0.000000e+00> : vector<16x32xf32>
    %86 = tpu.matmul %0, %85, %cst_30 {dimension_numbers = #tpu.dot_dimension_numbers<[1], [0], [0], [1], [0, 0, 1, 1], [], []>} : vector<16x16xf32>, vector<16x32xf32>, vector<16x32xf32> -> vector<16x32xf32>
    %c112 = arith.constant 112 : index
    %c0_31 = arith.constant 0 : index
    %87 = vector.load %arg5[%c112, %c0_31] : memref<288x32xf32, #tpu.memory_space<vmem>>, vector<32x32xf32>
    %cst_32 = arith.constant dense<0.000000e+00> : vector<16x32xf32>
    %88 = tpu.matmul %86, %87, %cst_32 {dimension_numbers = #tpu.dot_dimension_numbers<[1], [0], [0], [1], [0, 0, 1, 1], [], []>} : vector<16x32xf32>, vector<32x32xf32>, vector<16x32xf32> -> vector<16x32xf32>
    %89 = vector.extract_strided_slice %2 {offsets = [8, 0], sizes = [1, 32], strides = [1, 1]} : vector<16x32xf32> to vector<1x32xf32>
    %90 = vector.broadcast %89 : vector<1x32xf32> to vector<16x32xf32>
    %91 = arith.addf %88, %90 : vector<16x32xf32>
    %cst_33 = arith.constant 0.000000e+00 : f32
    %92 = vector.broadcast %cst_33 : f32 to vector<16x32xf32>
    %93 = arith.maximumf %91, %92 : vector<16x32xf32>
    %c144 = arith.constant 144 : index
    %c0_34 = arith.constant 0 : index
    %94 = vector.load %arg5[%c144, %c0_34] : memref<288x32xf32, #tpu.memory_space<vmem>>, vector<32x32xf32>
    %cst_35 = arith.constant dense<0.000000e+00> : vector<16x32xf32>
    %95 = tpu.matmul %93, %94, %cst_35 {dimension_numbers = #tpu.dot_dimension_numbers<[1], [0], [0], [1], [0, 0, 1, 1], [], []>} : vector<16x32xf32>, vector<32x32xf32>, vector<16x32xf32> -> vector<16x32xf32>
    %96 = vector.extract_strided_slice %2 {offsets = [9, 0], sizes = [1, 32], strides = [1, 1]} : vector<16x32xf32> to vector<1x32xf32>
    %97 = vector.broadcast %96 : vector<1x32xf32> to vector<16x32xf32>
    %98 = arith.addf %95, %97 : vector<16x32xf32>
    %cst_36 = arith.constant 0.000000e+00 : f32
    %99 = vector.broadcast %cst_36 : f32 to vector<16x32xf32>
    %100 = arith.maximumf %98, %99 : vector<16x32xf32>
    %cst_37 = arith.constant dense<0.000000e+00> : vector<32xf32>
    %101 = vector.multi_reduction <add>, %100, %cst_37 [0] : vector<16x32xf32> to vector<32xf32>
    %102 = vector.shape_cast %101 : vector<32xf32> to vector<1x32xf32>
    %cst_38 = arith.constant 1.600000e+01 : f32
    %103 = vector.broadcast %cst_38 : f32 to vector<1x32xf32>
    %104 = arith.divf %102, %103 : vector<1x32xf32>
    %105 = arith.mulf %100, %100 : vector<16x32xf32>
    %cst_39 = arith.constant dense<0.000000e+00> : vector<32xf32>
    %106 = vector.multi_reduction <add>, %105, %cst_39 [0] : vector<16x32xf32> to vector<32xf32>
    %107 = vector.shape_cast %106 : vector<32xf32> to vector<1x32xf32>
    %cst_40 = arith.constant 1.600000e+01 : f32
    %108 = vector.broadcast %cst_40 : f32 to vector<1x32xf32>
    %109 = arith.divf %107, %108 : vector<1x32xf32>
    %110 = arith.mulf %104, %104 : vector<1x32xf32>
    %111 = arith.subf %109, %110 : vector<1x32xf32>
    %cst_41 = arith.constant 0.000000e+00 : f32
    %112 = vector.broadcast %cst_41 : f32 to vector<1x32xf32>
    %113 = arith.maximumf %111, %112 : vector<1x32xf32>
    %114 = vector.broadcast %104 : vector<1x32xf32> to vector<16x32xf32>
    %115 = arith.subf %100, %114 : vector<16x32xf32>
    %cst_42 = arith.constant 9.99999974E-6 : f32
    %116 = vector.broadcast %cst_42 : f32 to vector<1x32xf32>
    %117 = arith.addf %113, %116 : vector<1x32xf32>
    %118 = math.rsqrt %117 : vector<1x32xf32>
    %119 = vector.broadcast %118 : vector<1x32xf32> to vector<16x32xf32>
    %120 = arith.mulf %115, %119 : vector<16x32xf32>
    %121 = vector.extract_strided_slice %2 {offsets = [10, 0], sizes = [1, 32], strides = [1, 1]} : vector<16x32xf32> to vector<1x32xf32>
    %122 = vector.broadcast %121 : vector<1x32xf32> to vector<16x32xf32>
    %123 = arith.mulf %120, %122 : vector<16x32xf32>
    %124 = vector.extract_strided_slice %2 {offsets = [11, 0], sizes = [1, 32], strides = [1, 1]} : vector<16x32xf32> to vector<1x32xf32>
    %125 = vector.broadcast %124 : vector<1x32xf32> to vector<16x32xf32>
    %126 = arith.addf %123, %125 : vector<16x32xf32>
    %127 = arith.addf %126, %86 : vector<16x32xf32>
    %c0_43 = arith.constant 0 : index
    %c0_44 = arith.constant 0 : index
    %128 = vector.load %arg2[%c0_43, %c0_44] : memref<2x16xf32, #tpu.memory_space<vmem>>, vector<2x16xf32>
    %cst_45 = arith.constant dense<0.000000e+00> : vector<2x32xf32>
    %129 = tpu.matmul %128, %127, %cst_45 {dimension_numbers = #tpu.dot_dimension_numbers<[1], [0], [0], [1], [0, 0, 1, 1], [], []>} : vector<2x16xf32>, vector<16x32xf32>, vector<2x32xf32> -> vector<2x32xf32>
    %c0_46 = arith.constant 0 : index
    %c0_47 = arith.constant 0 : index
    %130 = vector.load %arg3[%c0_46, %c0_47] : memref<2x1280xbf16, #tpu.memory_space<vmem>>, vector<2x1280xbf16>
    %c0_48 = arith.constant 0 : index
    %c0_49 = arith.constant 0 : index
    %131 = vector.load %arg4[%c0_48, %c0_49] : memref<1280x32xbf16, #tpu.memory_space<vmem>>, vector<1280x32xbf16>
    %cst_50 = arith.constant dense<0.000000e+00> : vector<2x32xf32>
    %132 = tpu.matmul %130, %131, %cst_50 {dimension_numbers = #tpu.dot_dimension_numbers<[1], [0], [0], [1], [0, 0, 1, 1], [], []>} : vector<2x1280xbf16>, vector<1280x32xbf16>, vector<2x32xf32> -> vector<2x32xf32>
    %133 = vector.extract_strided_slice %2 {offsets = [12, 0], sizes = [1, 32], strides = [1, 1]} : vector<16x32xf32> to vector<1x32xf32>
    %134 = vector.broadcast %133 : vector<1x32xf32> to vector<2x32xf32>
    %135 = arith.addf %132, %134 : vector<2x32xf32>
    %cst_51 = arith.constant 0.000000e+00 : f32
    %136 = vector.broadcast %cst_51 : f32 to vector<2x32xf32>
    %137 = arith.maximumf %135, %136 : vector<2x32xf32>
    %c176 = arith.constant 176 : index
    %c0_52 = arith.constant 0 : index
    %138 = vector.load %arg5[%c176, %c0_52] : memref<288x32xf32, #tpu.memory_space<vmem>>, vector<32x32xf32>
    %cst_53 = arith.constant dense<0.000000e+00> : vector<2x32xf32>
    %139 = tpu.matmul %129, %138, %cst_53 {dimension_numbers = #tpu.dot_dimension_numbers<[1], [0], [0], [1], [0, 0, 1, 1], [], []>} : vector<2x32xf32>, vector<32x32xf32>, vector<2x32xf32> -> vector<2x32xf32>
    %c208 = arith.constant 208 : index
    %c0_54 = arith.constant 0 : index
    %140 = vector.load %arg5[%c208, %c0_54] : memref<288x32xf32, #tpu.memory_space<vmem>>, vector<32x32xf32>
    %cst_55 = arith.constant dense<0.000000e+00> : vector<2x32xf32>
    %141 = tpu.matmul %137, %140, %cst_55 {dimension_numbers = #tpu.dot_dimension_numbers<[1], [0], [0], [1], [0, 0, 1, 1], [], []>} : vector<2x32xf32>, vector<32x32xf32>, vector<2x32xf32> -> vector<2x32xf32>
    %142 = arith.addf %139, %141 : vector<2x32xf32>
    %143 = vector.extract_strided_slice %2 {offsets = [13, 0], sizes = [1, 32], strides = [1, 1]} : vector<16x32xf32> to vector<1x32xf32>
    %144 = vector.broadcast %143 : vector<1x32xf32> to vector<2x32xf32>
    %145 = arith.addf %142, %144 : vector<2x32xf32>
    %cst_56 = arith.constant 0.000000e+00 : f32
    %146 = vector.broadcast %cst_56 : f32 to vector<2x32xf32>
    %147 = arith.maximumf %145, %146 : vector<2x32xf32>
    %c240 = arith.constant 240 : index
    %c0_57 = arith.constant 0 : index
    %148 = vector.load %arg5[%c240, %c0_57] : memref<288x32xf32, #tpu.memory_space<vmem>>, vector<32x32xf32>
    %cst_58 = arith.constant dense<0.000000e+00> : vector<2x32xf32>
    %149 = tpu.matmul %147, %148, %cst_58 {dimension_numbers = #tpu.dot_dimension_numbers<[1], [0], [0], [1], [0, 0, 1, 1], [], []>} : vector<2x32xf32>, vector<32x32xf32>, vector<2x32xf32> -> vector<2x32xf32>
    %150 = vector.extract_strided_slice %2 {offsets = [14, 0], sizes = [1, 32], strides = [1, 1]} : vector<16x32xf32> to vector<1x32xf32>
    %151 = vector.broadcast %150 : vector<1x32xf32> to vector<2x32xf32>
    %152 = arith.addf %149, %151 : vector<2x32xf32>
    %153 = vector.extract_strided_slice %152 {offsets = [0, 0], sizes = [2, 4], strides = [1, 1]} : vector<2x32xf32> to vector<2x4xf32>
    %c0_59 = arith.constant 0 : index
    %c0_60 = arith.constant 0 : index
    %154 = vector.load %arg6[%c0_59, %c0_60] : memref<2x4xf32, #tpu.memory_space<vmem>>, vector<2x4xf32>
    tpu.vector_store %arg6[%c0_59, %c0_60], %153 {strides = array<i32>} : memref<2x4xf32, #tpu.memory_space<vmem>>, vector<2x4xf32>,
    return
  }
}

</mosaic_0001>

<bundles_post_ra>
// kernel: tpu_custom_call.1
= control target key start
LH: loop header
LB: loop body
LE: loop exit
PB: predicated region body
PF: predicated region fallthrough
CT: control target
= control target key end

     0   :  { %vm31_vm0 = vcmask 130048   ;;  %s3380_s0 = inlined_call_operand.vmem [shape: f32[16,16], index: 0, kind: input, shape index: {}]   ;;  %s3381_s1 = inlined_call_operand.vmem [shape: f32[16,16], index: 1, kind: input, shape index: {}]   ;;  %s3382_s2 = inlined_call_operand.vmem [shape: f32[2,16], index: 2, kind: input, shape index: {}]   ;;  %s3383_s3 = inlined_call_operand.vmem [shape: bf16[2,1280], index: 3, kind: input, shape index: {}]   ;;  %s3384_s4 = inlined_call_operand.vmem [shape: bf16[1280,32], index: 4, kind: input, shape index: {}]   ;;  %s3385_s5 = inlined_call_operand.vmem [shape: f32[288,32], index: 5, kind: input, shape index: {}]   ;;  %s3386_s6 = inlined_call_operand.hbm [shape: f32[2,4], index: 6, kind: output, shape index: {}]  }
   0x1   :  { %v27_v0 = vld [vmem:[%s3381_s1] sm:$0xff]  ;;  %v28_v1 = vld [vmem:[%s3381_s1 + $0x8] sm:$0xff] }
   0x2   :  { %v2845_v2 = vld [vmem:[%s3380_s0] sm:$0xff]  ;;  %v2603_v3 = vpack.c.bf16 %v28_v1, %v27_v0  ;;  %v114_v5 = vld [vmem:[%s3385_s5 + $0x8] sm:$0xff] }
   0x3   :  { %2484 = vmatprep.mubr.msk.f32.mxu0 %vm31_vm0, %v2845_v2  ;;  %v113_v4 = vld [vmem:[%s3385_s5] sm:$0xff]  ;;  %2509 = vmatprep.mubr.msk.f32.mxu1 %vm31_vm0, %v2845_v2  ;;  %v2860_v6 = vld [vmem:[%s3380_s0 + $0x8] sm:$0xff] }
   0x4   :  { %v2607_v7 = vpack.c.bf16 %v114_v5, %v113_v4  ;;  %2604 = vmatprep.subr.bf16.mxu0 %v2603_v3 }
   0x5   :  { %2606 = vmatpush3.bf16.msra.mxu0 %v2603_v3 }
   0x6   :  { %2608 = vmatprep.subr.bf16.mxu0 %v2607_v7 }
   0x8   :  { %2485 = vmatmul.mubr.msk.f32.vlgmr.msra.gmra.mrb[0].mxu0 %vm31_vm0, %v2860_v6 }
   0x9   :  { %2610 = vmatpush3.bf16.msra.mxu0 %v2607_v7 }
   0xa   :  { %11 = vsyncpa [#allocation3], 0  ;;  %v202_v8 = vld [vmem:[%s3385_s5 + $0x10] sm:$0xff]  ;;  %v203_v9 = vld [vmem:[%s3385_s5 + $0x18] sm:$0xff]  ;;  %v115_v16 = vlaneseq  ;;  %vm210_vm1 = vcmask 261120   ;;  %vm2798_vm2 = vmmov 0  }
   0xb   :  { %v2611_v10 = vpack.c.bf16 %v203_v9, %v202_v8  ;;  %v204_v13 = vld [vmem:[%s3385_s5 + $0x20] sm:$0xff]  ;;  %v205_v14 = vld [vmem:[%s3385_s5 + $0x28] sm:$0xff]  ;;  %v2884_v19 = vld [vmem:[%s3385_s5 + $0x110] sm:$0xff]  ;;  %vm2187_vm3 = vcmask 25600  }
   0xc   :  { %v2615_v15 = vpack.c.bf16 %v205_v14, %v204_v13  ;;  %v2878_v17 = vshrl.u32 %v115_v16, 7  ;;  %v415_v16 = vld [vmem:[%s3385_s5 + $0x40] sm:$0xff] }
   0xd   :  { %2612 = vmatprep.subr.bf16.mxu0 %v2611_v10 }
   0xe   :  { %v117_v18 = vsub.s32 0, %v2878_v17  ;;  %v208_v27 = vsub.s32 1, %v2878_v17  ;;  %v328_v63 = vsub.s32 2, %v2878_v17  ;;  %v334_v0 = vsub.s32 3, %v2878_v17 }
  0x10   :  { %v118_v20 = vrot.slane %v2884_v19, %v117_v18  ;;  %v209_v28 = vrot.slane %v2884_v19, %v208_v27  ;;  %v329_v1 = vrot.slane %v2884_v19, %v328_v63  ;;  %v335_v7 = vrot.slane %v2884_v19, %v334_v0 }
  0xdb   :  { %v2486_v11 = vpop.f32.mrb[0].mxu0 }
  0xdc   :  { %v104_v12 = vpop.f32.mrb[1].mxu0 }
  0xdd   :  { %2491 = vmatprep.mubr.msk.f32.mxu0 %vm31_vm0, %v104_v12 }
  0xde   :  { %2492 = vmatmul.mubr.msk.f32.vlgmr.msra.gmra.mrb[2].mxu0 %vm31_vm0, %v2486_v11  ;;  %v414_v11 = vld [vmem:[%s3385_s5 + $0x38] sm:$0xff] }
  0xdf   :  { %2614 = vmatpush3.bf16.msra.mxu0 %v2611_v10  ;;  %v413_v10 = vld [vmem:[%s3385_s5 + $0x30] sm:$0xff] }
  0xe0   :  { %2616 = vmatprep.subr.bf16.mxu0 %v2615_v15 }
  0xe3   :  { %2618 = vmatpush3.bf16.msra.mxu0 %v2615_v15  ;;  %v2623_v15 = vpack.c.bf16 %v414_v11, %v413_v10 }
 0x1b1   :  { %v2493_v21 = vpop.f32.mrb[2].mxu0 }
 0x1b2   :  { %v197_v22 = vadd.f32 %v2493_v21, %v118_v20  ;;  %v191_v23 = vpop.f32.mrb[3].mxu0 }
 0x1b3   :  { %v192_v24 = vadd.f32 %v191_v23, %v118_v20  ;;  %v416_v20 = vld [vmem:[%s3385_s5 + $0x48] sm:$0xff]  ;;  %v505_v23 = vld [vmem:[%s3385_s5 + $0x58] sm:$0xff] }
 0x1b4   :  { %v201_v26 = vmax.f32 %v197_v22, 0.0  ;;  %v2627_v21 = vpack.c.bf16 %v416_v20, %v415_v16  ;;  %v504_v22 = vld [vmem:[%s3385_s5 + $0x50] sm:$0xff] }
 0x1b5   :  { %v200_v25 = vmax.f32 %v192_v24, 0.0  ;;  %v2631_v24 = vpack.c.bf16 %v505_v23, %v504_v22  ;;  %v628_v23 = vsub.s32 6, %v2878_v17 }
 0x1b7   :  { %2502 = vmatprep.mubr.msk.f32.mxu0 %vm210_vm1, %v200_v25  ;;  %2632 = vmatprep.subr.bf16.mxu0 %v2631_v24 }
 0x1b8   :  { %2503 = vmatmul.mubr.msk.f32.vlgmr.msra.gmra.mrb[4].mxu0 %vm210_vm1, %v201_v26 }
 0x1b9   :  { %2634 = vmatpush3.bf16.msra.mxu0 %v2631_v24  ;;  %v634_v24 = vsub.s32 7, %v2878_v17 }
 0x28b   :  { %v2504_v29 = vpop.f32.mrb[4].mxu0 }
 0x28c   :  { %v289_v30 = vadd.f32 %v2504_v29, %v209_v28  ;;  %v283_v31 = vpop.f32.mrb[5].mxu0  ;;  %v507_v29 = vld [vmem:[%s3385_s5 + $0x68] sm:$0xff] }
 0x28d   :  { %v284_v32 = vadd.f32 %v283_v31, %v209_v28  ;;  %v506_v28 = vld [vmem:[%s3385_s5 + $0x60] sm:$0xff]  ;;  %v419_v31 = vsub.s32 4, %v2878_v17 }
 0x28e   :  { %v293_v33 = vmax.f32 %v289_v30, 0.0  ;;  %v2635_v30 = vpack.c.bf16 %v507_v29, %v506_v28  ;;  %v629_v28 = vrot.slane %v2884_v19, %v628_v23 }
 0x28f   :  { %v292_v34 = vmax.f32 %v284_v32, 0.0  ;;  %v420_v32 = vrot.slane %v2884_v19, %v419_v31 }
 0x290   :  { %v295_v35 = vsel %vm210_vm1, %v293_v33, 0.0  ;;  %v306_v36 = vmul.f32 %v293_v33, %v293_v33  ;;  %2636 = vmatprep.subr.bf16.mxu0 %v2635_v30 }
 0x291   :  { %v294_v37 = vsel %vm210_vm1, %v292_v34, 0.0  ;;  %v305_v38 = vmul.f32 %v292_v34, %v292_v34  ;;  %2638 = vmatpush3.bf16.msra.mxu0 %v2635_v30 }
 0x292   :  { %v308_v39 = vsel %vm210_vm1, %v306_v36, 0.0  ;;  %v296_v40 = vadd.f32 %v295_v35, %v294_v37 }
 0x293   :  { %v307_v41 = vsel %vm210_vm1, %v305_v38, 0.0  ;;  %v715_v38 = vld [vmem:[%s3385_s5 + $0x70] sm:$0xff] }
 0x294   :  { %v297_v42 = vrot.slane %v296_v40, 4  ;;  %v309_v43 = vadd.f32 %v308_v39, %v307_v41  ;;  %v716_v39 = vld [vmem:[%s3385_s5 + $0x78] sm:$0xff] }
 0x295   :  { %v2643_v41 = vpack.c.bf16 %v716_v39, %v715_v38 }
 0x296   :  { %v298_v44 = vadd.f32 %v297_v42, %v296_v40  ;;  %v310_v45 = vrot.slane %v309_v43, 4  ;;  %v717_v40 = vld [vmem:[%s3385_s5 + $0x80] sm:$0xff]  ;;  %v718_v42 = vld [vmem:[%s3385_s5 + $0x88] sm:$0xff] }
 0x297   :  { %2644 = vmatprep.subr.bf16.mxu0 %v2643_v41 }
 0x298   :  { %v299_v46 = vrot.slane %v298_v44, 2  ;;  %v311_v47 = vadd.f32 %v310_v45, %v309_v43  ;;  %v2647_v43 = vpack.c.bf16 %v718_v42, %v717_v40  ;;  %v806_v40 = vld [vmem:[%s3385_s5 + $0x90] sm:$0xff]  ;;  %v809_v42 = vld [vmem:[%s3385_s5 + $0xa8] sm:$0xff] }
 0x29a   :  { %v300_v48 = vadd.f32 %v299_v46, %v298_v44  ;;  %v312_v49 = vrot.slane %v311_v47, 2  ;;  %v510_v44 = vsub.s32 5, %v2878_v17 }
 0x29c   :  { %v301_v50 = vrot.slane %v300_v48, 1  ;;  %v313_v51 = vadd.f32 %v312_v49, %v311_v47  ;;  %v511_v45 = vrot.slane %v2884_v19, %v510_v44 }
 0x29e   :  { %v302_v52 = vadd.f32 %v301_v50, %v300_v48  ;;  %v314_v53 = vrot.slane %v313_v51, 1 }
 0x2a0   :  { %v304_v54 = vmul.f32 0.0625, %v302_v52  ;;  %v315_v55 = vadd.f32 %v314_v53, %v313_v51 }
 0x2a2   :  { %v316_v56 = vmul.f32 0.0625, %v315_v55  ;;  %v317_v57 = vmul.f32 %v304_v54, %v304_v54  ;;  %v320_v58 = vsub.f32 %v292_v34, %v304_v54  ;;  %v321_v59 = vsub.f32 %v293_v33, %v304_v54 }
 0x2a4   :  { %v318_v60 = vsub.f32 %v316_v56, %v317_v57 }
 0x2a6   :  { %v319_v61 = vmax.f32 %v318_v60, 0.0 }
 0x2a8   :  { %v322_v62 = vadd.f32 1e-05, %v319_v61 }
 0x2aa   :  { %2766 = vrsqrt.f32 %v322_v62 }
 0x2b4   :  { %v2767_v3 = vpop.eup %2766 }
 0x2b5   :  { %v324_v4 = vmul.f32 %v2767_v3, %v320_v58  ;;  %v325_v5 = vmul.f32 %v2767_v3, %v321_v59 }
 0x2b7   :  { %v330_v8 = vmul.f32 %v329_v1, %v324_v4  ;;  %v331_v9 = vmul.f32 %v329_v1, %v325_v5 }
 0x2b9   :  { %v336_v12 = vadd.f32 %v335_v7, %v330_v8  ;;  %v337_v13 = vadd.f32 %v335_v7, %v331_v9 }
 0x2bb   :  { %v2619_v14 = vpack.c.bf16 %v337_v13, %v336_v12 }
 0x2bd   :  { %2620 = vmatprep.subr.bf16.mxu1 %v2619_v14 }
 0x2be   :  { %2622 = vmatpush3.bf16.msra.mxu1 %v2619_v14 }
 0x2bf   :  { %2624 = vmatprep.subr.bf16.mxu1 %v2623_v15 }
 0x2c1   :  { %2510 = vmatmul.mubr.msk.f32.vlgmr.msra.gmra.mrb[0].mxu1 %vm31_vm0, %v2860_v6 }
 0x2c2   :  { %2626 = vmatpush3.bf16.msra.mxu1 %v2623_v15 }
 0x2c3   :  { %2628 = vmatprep.subr.bf16.mxu1 %v2627_v21 }
 0x2c6   :  { %2630 = vmatpush3.bf16.msra.mxu1 %v2627_v21 }
 0x394   :  { %v2927_v25 = vpop.f32.mrb[0].mxu1 }
 0x395   :  { %v2929_v26 = vpop.f32.mrb[1].mxu1 }
 0x396   :  { %2520 = vmatprep.mubr.msk.f32.mxu1 %vm210_vm1, %v2929_v26 }
 0x397   :  { %2521 = vmatmul.mubr.msk.f32.vlgmr.msra.gmra.mrb[2].mxu1 %vm210_vm1, %v2927_v25 }
 0x398   :  { %2538 = vmatprep.mubr.msk.f32.mxu1 %vm31_vm0, %v2845_v2 }
 0x46a   :  { %v2522_v33 = vpop.f32.mrb[2].mxu1 }
 0x46b   :  { %v499_v34 = vadd.f32 %v2522_v33, %v420_v32  ;;  %v493_v2 = vpop.f32.mrb[3].mxu1  ;;  %v635_v33 = vrot.slane %v2884_v19, %v634_v24  ;;  %v807_v19 = vld [vmem:[%s3385_s5 + $0x98] sm:$0xff]  ;;  %v2704_v24 = vld [vmem:[%s3384_s4 + $0x100] sm:$0xff]  }
 0x46c   :  { %v494_v35 = vadd.f32 %v493_v2, %v420_v32 }
 0x46d   :  { %v503_v37 = vmax.f32 %v499_v34, 0.0 }
 0x46e   :  { %v502_v36 = vmax.f32 %v494_v35, 0.0 }
 0x470   :  { %2531 = vmatprep.mubr.msk.f32.mxu0 %vm210_vm1, %v502_v36 }
 0x471   :  { %2532 = vmatmul.mubr.msk.f32.vlgmr.msra.gmra.mrb[6].mxu0 %vm210_vm1, %v503_v37 }
 0x472   :  { %2646 = vmatpush3.bf16.msra.mxu0 %v2643_v41  ;;  %v2651_v41 = vpack.c.bf16 %v807_v19, %v806_v40  ;;  %v2730_v19 = vld [vmem:[%s3384_s4 + $0x178] sm:$0xff]  }
 0x473   :  { %2648 = vmatprep.subr.bf16.mxu0 %v2647_v43 }
 0x476   :  { %2650 = vmatpush3.bf16.msra.mxu0 %v2647_v43 }
 0x544   :  { %v2533_v46 = vpop.f32.mrb[6].mxu0 }
 0x545   :  { %v590_v47 = vadd.f32 %v2533_v46, %v511_v45  ;;  %v584_v48 = vpop.f32.mrb[7].mxu0 }
 0x546   :  { %v585_v49 = vadd.f32 %v584_v48, %v511_v45  ;;  %v3002_v45 = vld [vmem:[%s3385_s5 + $0x118] sm:$0xff] }
 0x547   :  { %v594_v50 = vmax.f32 %v590_v47, 0.0  ;;  %v722_v46 = vrot.slane %v3002_v45, %v117_v18  ;;  %v2687_v18 = vld [vmem:[%s3384_s4 + $0x48] sm:$0xff]  }
 0x548   :  { %v593_v51 = vmax.f32 %v585_v49, 0.0 }
 0x549   :  { %v596_v52 = vsel %vm210_vm1, %v594_v50, 0.0  ;;  %v606_v53 = vmul.f32 %v594_v50, %v594_v50 }
 0x54a   :  { %v595_v54 = vsel %vm210_vm1, %v593_v51, 0.0  ;;  %v605_v55 = vmul.f32 %v593_v51, %v593_v51 }
 0x54b   :  { %v608_v56 = vsel %vm210_vm1, %v606_v53, 0.0  ;;  %v597_v57 = vadd.f32 %v596_v52, %v595_v54  ;;  %v2685_v53 = vld [vmem:[%s3384_s4 + $0x40] sm:$0xff]  }
 0x54c   :  { %v607_v58 = vsel %vm210_vm1, %v605_v55, 0.0  ;;  %v2686_v54 = vld [vmem:[%s3384_s4] sm:$0xff]   ;;  %v2688_v55 = vld [vmem:[%s3384_s4 + $0x8] sm:$0xff]  }
 0x54d   :  { %v598_v59 = vrot.slane %v597_v57, 4  ;;  %v609_v60 = vadd.f32 %v608_v56, %v607_v58  ;;  %v2689_v56 = vld [vmem:[%s3384_s4 + $0x50] sm:$0xff]   ;;  %v2691_v58 = vld [vmem:[%s3384_s4 + $0x58] sm:$0xff]  }
 0x54f   :  { %v599_v61 = vadd.f32 %v598_v59, %v597_v57  ;;  %v610_v62 = vrot.slane %v609_v60, 4  ;;  %v2690_v57 = vld [vmem:[%s3384_s4 + $0x10] sm:$0xff]   ;;  %v2692_v59 = vld [vmem:[%s3384_s4 + $0x18] sm:$0xff]  }
 0x551   :  { %v600_v1 = vrot.slane %v599_v61, 2  ;;  %v611_v3 = vadd.f32 %v610_v62, %v609_v60  ;;  %v2693_v60 = vld [vmem:[%s3384_s4 + $0x60] sm:$0xff]   ;;  %v2695_v62 = vld [vmem:[%s3384_s4 + $0x68] sm:$0xff]  }
 0x553   :  { %v601_v4 = vadd.f32 %v600_v1, %v599_v61  ;;  %v612_v5 = vrot.slane %v611_v3, 2  ;;  %v2694_v61 = vld [vmem:[%s3384_s4 + $0x20] sm:$0xff]   ;;  %v2696_v1 = vld [vmem:[%s3384_s4 + $0x28] sm:$0xff]  }
 0x555   :  { %v602_v7 = vrot.slane %v601_v4, 1  ;;  %v613_v8 = vadd.f32 %v612_v5, %v611_v3  ;;  %v2796_v3 = vmov 1966171168   ;;  %v2697_v5 = vld [vmem:[%s3384_s4 + $0x70] sm:$0xff]  }
 0x557   :  { %v603_v9 = vadd.f32 %v602_v7, %v601_v4  ;;  %v614_v10 = vrot.slane %v613_v8, 1  ;;  %v1186_v4 = vunpack.c.l.s4 %v2796_v3  ;;  %v2698_v7 = vld [vmem:[%s3384_s4 + $0x30] sm:$0xff]  }
 0x559   :  { %v604_v11 = vmul.f32 0.0625, %v603_v9  ;;  %v615_v12 = vadd.f32 %v614_v10, %v613_v8  ;;  %v2699_v8 = vld [vmem:[%s3384_s4 + $0x78] sm:$0xff]   ;;  %v1187_v9 = vunpack.c.0.s8 %v1186_v4  ;;  %v2797_v10 = vmov 0.0|0.0  }
 0x55a   :  { %2659 = vmatprep.subr.bf16.mxu0 %v2797_v10 }
 0x55b   :  { %v616_v13 = vmul.f32 0.0625, %v615_v12  ;;  %v617_v14 = vmul.f32 %v604_v11, %v604_v11  ;;  %v620_v15 = vsub.f32 %v593_v51, %v604_v11  ;;  %v621_v16 = vsub.f32 %v594_v50, %v604_v11  ;;  %v1016_v12 = vld [vmem:[%s3383_s3] sm:$0xff] }
 0x55c   :  { %v3056_v11 = vsub.s32 %v1187_v9, %v2878_v17  ;;  %v1184_v40 = vcombine.high %v1016_v12, %v1016_v12 }
 0x55d   :  { %v618_v20 = vsub.f32 %v616_v13, %v617_v14  ;;  %v2700_v14 = vld [vmem:[%s3384_s4 + $0x38] sm:$0xff]  }
 0x55e   :  { %v1191_v13 = vrot.slane %v1016_v12, %v3056_v11 }
 0x55f   :  { %v619_v21 = vmax.f32 %v618_v20, 0.0  ;;  %v2702_v20 = vld [vmem:[%s3384_s4 + $0x140] sm:$0xff]  }
 0x561   :  { %v622_v22 = vadd.f32 1e-05, %v619_v21  ;;  %v2799_v21 = vmov 0.0  }
 0x563   :  { %2768 = vrsqrt.f32 %v622_v22  ;;  %v3074_v22 = vrot.slane %v1191_v13, %v3056_v11 }
 0x56d   :  { %v2769_v29 = vpop.eup %2768 }
 0x56e   :  { %v624_v30 = vmul.f32 %v2769_v29, %v620_v15  ;;  %v625_v32 = vmul.f32 %v2769_v29, %v621_v16  ;;  %v1199_v15 = vcombine.high %v1191_v13, %v1191_v13  ;;  %v2708_v29 = vld [vmem:[%s3384_s4 + $0x108] sm:$0xff]  }
 0x570   :  { %v630_v34 = vmul.f32 %v629_v28, %v624_v30  ;;  %v631_v2 = vmul.f32 %v629_v28, %v625_v32  ;;  %v3066_v16 = vrot.slane %v1199_v15, %v3056_v11  ;;  %v2706_v28 = vld [vmem:[%s3384_s4 + $0x148] sm:$0xff]   ;;  %v2710_v30 = vld [vmem:[%s3384_s4 + $0x150] sm:$0xff]  }
 0x571   :  { %v2712_v32 = vld [vmem:[%s3384_s4 + $0x110] sm:$0xff]  }
 0x572   :  { %v636_v35 = vadd.f32 %v635_v33, %v630_v34  ;;  %v637_v36 = vadd.f32 %v635_v33, %v631_v2  ;;  %v2714_v33 = vld [vmem:[%s3384_s4 + $0x158] sm:$0xff]   ;;  %v2718_v2 = vld [vmem:[%s3384_s4 + $0x160] sm:$0xff]  }
 0x573   :  { %v2716_v34 = vld [vmem:[%s3384_s4 + $0x118] sm:$0xff]  }
 0x574   :  { %v638_v37 = vadd.f32 %v636_v35, %v2929_v26  ;;  %v639_v38 = vadd.f32 %v2927_v25, %v637_v36  ;;  %v2720_v35 = vld [vmem:[%s3384_s4 + $0x120] sm:$0xff]   ;;  %v2722_v36 = vld [vmem:[%s3384_s4 + $0x168] sm:$0xff]  }
 0x576   :  { %v2639_v39 = vpack.c.bf16 %v639_v38, %v638_v37  ;;  %v2724_v37 = vld [vmem:[%s3384_s4 + $0x128] sm:$0xff]   ;;  %v2726_v38 = vld [vmem:[%s3384_s4 + $0x170] sm:$0xff]  }
 0x578   :  { %2640 = vmatprep.subr.bf16.mxu1 %v2639_v39 }
 0x579   :  { %2642 = vmatpush3.bf16.msra.mxu1 %v2639_v39  ;;  %v2728_v39 = vld [vmem:[%s3384_s4 + $0x130] sm:$0xff]  }
 0x57a   :  { %2652 = vmatprep.subr.bf16.mxu1 %v2651_v41 }
 0x57c   :  { %2539 = vmatmul.mubr.msk.f32.vlgmr.msra.gmra.mrb[4].mxu1 %vm31_vm0, %v2860_v6  ;;  %v808_v6 = vld [vmem:[%s3385_s5 + $0xa0] sm:$0xff] }
 0x57d   :  { %2654 = vmatpush3.bf16.msra.mxu1 %v2651_v41  ;;  %v2655_v43 = vpack.c.bf16 %v809_v42, %v808_v6  ;;  %v1198_v41 = vrot.slane %v1184_v40, %v3056_v11  ;;  %v2732_v6 = vld [vmem:[%s3384_s4 + $0x138] sm:$0xff]  }
 0x57f   :  { %2656 = vmatprep.subr.bf16.mxu1 %v2655_v43  ;;  %v1200_v42 = vcombine.high %v1198_v41, %v1198_v41 }
 0x581   :  { %2658 = vmatpush3.bf16.msra.mxu1 %v2655_v43  ;;  %v3125_v43 = vrot.slane %v1200_v42, %v3056_v11 }
 0x582   :  { %2355 = vmatprep.subr.bf16.mxu1 %v2685_v53  ;;  %v2747_v53 = vld [vmem:[%s3384_s4 + $0x258] sm:$0xff]  }
 0x64f   :  { %v2985_v26 = vpop.f32.mrb[4].mxu1 }
 0x650   :  { %v2987_v25 = vpop.f32.mrb[5].mxu1 }
 0x651   :  { %2549 = vmatprep.mubr.msk.f32.mxu0 %vm210_vm1, %v2987_v25 }
 0x652   :  { %2550 = vmatmul.mubr.msk.f32.vlgmr.msra.gmra.mrb[8].mxu0 %vm210_vm1, %v2985_v26 }
 0x653   :  { %2567 = vmatprep.mubr.msk.f32.mxu0 %vm2798_vm2, %v2799_v21 }
 0x725   :  { %v2551_v47 = vpop.f32.mrb[8].mxu0 }
 0x726   :  { %v801_v48 = vadd.f32 %v2551_v47, %v722_v46  ;;  %v795_v49 = vpop.f32.mrb[9].mxu0  ;;  %v3131_v47 = vrot.slane %v1198_v41, %v3056_v11 }
 0x727   :  { %v796_v50 = vadd.f32 %v795_v49, %v722_v46  ;;  %v2735_v46 = vld [vmem:[%s3384_s4 + $0x240] sm:$0xff]   ;;  %v2739_v49 = vld [vmem:[%s3384_s4 + $0x248] sm:$0xff]  }
 0x728   :  { %v805_v52 = vmax.f32 %v801_v48, 0.0  ;;  %v2737_v48 = vld [vmem:[%s3384_s4 + $0x200] sm:$0xff]  }
 0x729   :  { %v804_v51 = vmax.f32 %v796_v50, 0.0  ;;  %v2741_v50 = vld [vmem:[%s3384_s4 + $0x208] sm:$0xff]  }
 0x72b   :  { %2560 = vmatprep.mubr.msk.f32.mxu1 %vm210_vm1, %v804_v51  ;;  %v2743_v51 = vld [vmem:[%s3384_s4 + $0x250] sm:$0xff]  }
 0x72c   :  { %2561 = vmatmul.mubr.msk.f32.vlgmr.msra.gmra.mrb[6].mxu1 %vm210_vm1, %v805_v52  ;;  %v2745_v52 = vld [vmem:[%s3384_s4 + $0x210] sm:$0xff]  }
 0x72d   :  { %2356 = vmatpush3.bf16.msra.mxu1 %v2686_v54  ;;  %1777 = vmatprep.mubr.bf16.mxu1 %v3066_v16  ;;  %v2749_v54 = vld [vmem:[%s3384_s4 + $0x218] sm:$0xff]  }
 0x72e   :  { %2357 = vmatprep.subr.bf16.mxu1 %v2687_v18  ;;  %v2751_v18 = vld [vmem:[%s3384_s4 + $0x260] sm:$0xff]  }
 0x731   :  { %2358 = vmatpush3.bf16.msra.mxu1 %v2688_v55  ;;  %v2753_v55 = vld [vmem:[%s3384_s4 + $0x220] sm:$0xff]  }
 0x732   :  { %2359 = vmatprep.subr.bf16.mxu1 %v2689_v56  ;;  %v2755_v56 = vld [vmem:[%s3384_s4 + $0x268] sm:$0xff]  }
 0x735   :  { %2360 = vmatpush3.bf16.msra.mxu1 %v2690_v57  ;;  %v2757_v57 = vld [vmem:[%s3384_s4 + $0x228] sm:$0xff]  }
 0x736   :  { %2361 = vmatprep.subr.bf16.mxu1 %v2691_v58  ;;  %v2759_v58 = vld [vmem:[%s3384_s4 + $0x270] sm:$0xff]  }
 0x739   :  { %2362 = vmatpush3.bf16.msra.mxu1 %v2692_v59  ;;  %v2761_v59 = vld [vmem:[%s3384_s4 + $0x230] sm:$0xff]  }
 0x73a   :  { %2363 = vmatprep.subr.bf16.mxu1 %v2693_v60  ;;  %v2763_v60 = vld [vmem:[%s3384_s4 + $0x278] sm:$0xff]  }
 0x73d   :  { %2364 = vmatpush3.bf16.msra.mxu1 %v2694_v61  ;;  %v2222_v61 = vld.sshfl [vmem:[%s3383_s3 + $0x8] sm:$0x11 pattern:$0x75316420] }
 0x73e   :  { %2365 = vmatprep.subr.bf16.mxu1 %v2695_v62  ;;  %v2765_v62 = vld [vmem:[%s3384_s4 + $0x238] sm:$0xff]   ;;  %v1247_v4 = vrot.slane %v2222_v61, %v3056_v11 }
 0x741   :  { %2366 = vmatpush3.bf16.msra.mxu1 %v2696_v1  ;;  %v1240_v1 = vcombine.high %v2222_v61, %v2222_v61 }
 0x742   :  { %2367 = vmatprep.subr.bf16.mxu1 %v2697_v5  ;;  %v813_v5 = vrot.slane %v3002_v45, %v208_v27 }
 0x743   :  { %v1254_v3 = vrot.slane %v1240_v1, %v3056_v11  ;;  %v2701_v1 = vld [vmem:[%s3384_s4 + $0xc0] sm:$0xff]  }
 0x745   :  { %2368 = vmatpush3.bf16.msra.mxu1 %v2698_v7 }
 0x746   :  { %2369 = vmatprep.subr.bf16.mxu1 %v2699_v8 }
 0x749   :  { %2370 = vmatpush3.bf16.msra.mxu1 %v2700_v14 }
 0x74a   :  { %2399 = vmatprep.subr.bf16.mxu1 %v2702_v20 }
 0x74c   :  { %1778 = vmatmul.mubr.bf16.vlgmr.msra.gmra.mrb[8].mxu1 %v3074_v22 }
 0x74d   :  { %2400 = vmatpush3.bf16.msra.mxu1 %v2704_v24  ;;  %1857 = vmatprep.mubr.bf16.mxu1 %v3125_v43 }
 0x74e   :  { %2401 = vmatprep.subr.bf16.mxu1 %v2706_v28 }
 0x751   :  { %2402 = vmatpush3.bf16.msra.mxu1 %v2708_v29 }
 0x752   :  { %2403 = vmatprep.subr.bf16.mxu1 %v2710_v30 }
 0x755   :  { %2404 = vmatpush3.bf16.msra.mxu1 %v2712_v32 }
 0x756   :  { %2405 = vmatprep.subr.bf16.mxu1 %v2714_v33 }
 0x759   :  { %2406 = vmatpush3.bf16.msra.mxu1 %v2716_v34 }
 0x75a   :  { %2407 = vmatprep.subr.bf16.mxu1 %v2718_v2 }
 0x75d   :  { %2408 = vmatpush3.bf16.msra.mxu1 %v2720_v35 }
 0x75e   :  { %2409 = vmatprep.subr.bf16.mxu1 %v2722_v36 }
 0x761   :  { %2410 = vmatpush3.bf16.msra.mxu1 %v2724_v37 }
 0x762   :  { %2411 = vmatprep.subr.bf16.mxu1 %v2726_v38 }
 0x765   :  { %2412 = vmatpush3.bf16.msra.mxu1 %v2728_v39 }
 0x766   :  { %2413 = vmatprep.subr.bf16.mxu1 %v2730_v19 }
 0x769   :  { %2414 = vmatpush3.bf16.msra.mxu1 %v2732_v6 }
 0x76a   :  { %2443 = vmatprep.subr.bf16.mxu1 %v2735_v46 }
 0x76c   :  { %1858 = vmatmul.mubr.bf16.vlgmr.msra.gmra.mrb[12].mxu1 %v3131_v47 }
 0x76d   :  { %2444 = vmatpush3.bf16.msra.mxu1 %v2737_v48  ;;  %1937 = vmatprep.mubr.bf16.mxu1 %v1254_v3  ;;  %v2703_v3 = vld [vmem:[%s3384_s4 + $0x80] sm:$0xff]  }
 0x76e   :  { %2445 = vmatprep.subr.bf16.mxu1 %v2739_v49 }
 0x771   :  { %2446 = vmatpush3.bf16.msra.mxu1 %v2741_v50 }
 0x772   :  { %2447 = vmatprep.subr.bf16.mxu1 %v2743_v51 }
 0x775   :  { %2448 = vmatpush3.bf16.msra.mxu1 %v2745_v52 }
 0x776   :  { %2449 = vmatprep.subr.bf16.mxu1 %v2747_v53  ;;  %v931_v53 = vrot.slane %v3002_v45, %v328_v63 }
 0x779   :  { %2450 = vmatpush3.bf16.msra.mxu1 %v2749_v54 }
 0x77a   :  { %2451 = vmatprep.subr.bf16.mxu1 %v2751_v18  ;;  %v937_v18 = vrot.slane %v3002_v45, %v334_v0  ;;  %v942_v0 = vld [vmem:[%s3382_s2] sm:$0x3] }
 0x77d   :  { %2452 = vmatpush3.bf16.msra.mxu1 %v2753_v55 }
 0x77e   :  { %2453 = vmatprep.subr.bf16.mxu1 %v2755_v56 }
 0x781   :  { %2454 = vmatpush3.bf16.msra.mxu1 %v2757_v57 }
 0x782   :  { %2455 = vmatprep.subr.bf16.mxu1 %v2759_v58 }
 0x785   :  { %2456 = vmatpush3.bf16.msra.mxu1 %v2761_v59 }
 0x786   :  { %2457 = vmatprep.subr.bf16.mxu1 %v2763_v60 }
 0x789   :  { %2458 = vmatpush3.bf16.msra.mxu1 %v2765_v62 }
 0x78c   :  { %1938 = vmatmul.mubr.bf16.vlgmr.msra.gmra.mrb[16].mxu1 %v1247_v4  ;;  %v1231_v4 = vcombine.high %v3066_v16, %v3066_v16  ;;  %v2711_v16 = vld [vmem:[%s3384_s4 + $0x90] sm:$0xff]  }
 0x7ff   :  { %v2562_v7 = vpop.f32.mrb[6].mxu1 }
 0x800   :  { %v892_v8 = vadd.f32 %v2562_v7, %v813_v5  ;;  %v886_v9 = vpop.f32.mrb[7].mxu1  ;;  %v2713_v7 = vld [vmem:[%s3384_s4 + $0xd8] sm:$0xff]  }
 0x801   :  { %v887_v12 = vadd.f32 %v886_v9, %v813_v5  ;;  %v2709_v5 = vld [vmem:[%s3384_s4 + $0xd0] sm:$0xff]   ;;  %v2717_v9 = vld [vmem:[%s3384_s4 + $0xe0] sm:$0xff]  }
 0x802   :  { %v896_v13 = vmax.f32 %v892_v8, 0.0  ;;  %v2715_v8 = vld [vmem:[%s3384_s4 + $0x98] sm:$0xff]  }
 0x803   :  { %v895_v14 = vmax.f32 %v887_v12, 0.0  ;;  %v2719_v12 = vld [vmem:[%s3384_s4 + $0xa0] sm:$0xff]  }
 0x804   :  { %v898_v15 = vsel %vm210_vm1, %v896_v13, 0.0  ;;  %v908_v20 = vmul.f32 %v896_v13, %v896_v13 }
 0x805   :  { %v897_v24 = vsel %vm210_vm1, %v895_v14, 0.0  ;;  %v907_v28 = vmul.f32 %v895_v14, %v895_v14 }
 0x806   :  { %v910_v11 = vsel %vm210_vm1, %v908_v20, 0.0  ;;  %v899_v29 = vadd.f32 %v898_v15, %v897_v24  ;;  %v2725_v15 = vld [vmem:[%s3384_s4 + $0xf0] sm:$0xff]   ;;  %v2729_v24 = vld [vmem:[%s3384_s4 + $0xf8] sm:$0xff]  }
 0x807   :  { %v909_v30 = vsel %vm210_vm1, %v907_v28, 0.0  ;;  %v2727_v20 = vld [vmem:[%s3384_s4 + $0xb0] sm:$0xff]   ;;  %v2731_v28 = vld [vmem:[%s3384_s4 + $0xb8] sm:$0xff]  }
 0x808   :  { %v900_v32 = vrot.slane %v899_v29, 4  ;;  %v911_v33 = vadd.f32 %v910_v11, %v909_v30  ;;  %v2734_v11 = vld [vmem:[%s3384_s4 + $0x1c0] sm:$0xff]  }
 0x809   :  { %v2736_v30 = vld [vmem:[%s3384_s4 + $0x180] sm:$0xff]  }
 0x80a   :  { %v901_v27 = vadd.f32 %v900_v32, %v899_v29  ;;  %v912_v34 = vrot.slane %v911_v33, 4  ;;  %v1229_v29 = vcombine.high %v3074_v22, %v3074_v22  ;;  %v1232_v32 = vcombine.high %v3125_v43, %v3125_v43  ;;  %v2742_v22 = vld [vmem:[%s3384_s4 + $0x1d0] sm:$0xff]  }
 0x80b   :  { %v2744_v43 = vld [vmem:[%s3384_s4 + $0x190] sm:$0xff]  }
 0x80c   :  { %v902_v2 = vrot.slane %v901_v27, 2  ;;  %v913_v35 = vadd.f32 %v912_v34, %v911_v33  ;;  %v2738_v33 = vld [vmem:[%s3384_s4 + $0x1c8] sm:$0xff]   ;;  %v2746_v34 = vld [vmem:[%s3384_s4 + $0x1d8] sm:$0xff]  }
 0x80e   :  { %v903_v36 = vadd.f32 %v902_v2, %v901_v27  ;;  %v914_v37 = vrot.slane %v913_v35, 2  ;;  %v2740_v27 = vld [vmem:[%s3384_s4 + $0x188] sm:$0xff]   ;;  %v2748_v2 = vld [vmem:[%s3384_s4 + $0x198] sm:$0xff]  }
 0x810   :  { %v904_v38 = vrot.slane %v903_v36, 1  ;;  %v915_v39 = vadd.f32 %v914_v37, %v913_v35  ;;  %v2750_v35 = vld [vmem:[%s3384_s4 + $0x1e0] sm:$0xff]   ;;  %v2754_v37 = vld [vmem:[%s3384_s4 + $0x1e8] sm:$0xff]  }
 0x812   :  { %v905_v40 = vadd.f32 %v904_v38, %v903_v36  ;;  %v916_v19 = vrot.slane %v915_v39, 1  ;;  %v2752_v36 = vld [vmem:[%s3384_s4 + $0x1a0] sm:$0xff]   ;;  %v2756_v38 = vld [vmem:[%s3384_s4 + $0x1a8] sm:$0xff]  }
 0x814   :  { %v906_v41 = vmul.f32 0.0625, %v905_v40  ;;  %v917_v6 = vadd.f32 %v916_v19, %v915_v39  ;;  %v2758_v39 = vld [vmem:[%s3384_s4 + $0x1f0] sm:$0xff]   ;;  %v2762_v19 = vld [vmem:[%s3384_s4 + $0x1f8] sm:$0xff]  }
 0x815   :  { %v2760_v40 = vld [vmem:[%s3384_s4 + $0x1b0] sm:$0xff]  }
 0x816   :  { %v918_v42 = vmul.f32 0.0625, %v917_v6  ;;  %v919_v46 = vmul.f32 %v906_v41, %v906_v41  ;;  %v922_v48 = vsub.f32 %v895_v14, %v906_v41  ;;  %v923_v49 = vsub.f32 %v896_v13, %v906_v41  ;;  %v2721_v13 = vld [vmem:[%s3384_s4 + $0xe8] sm:$0xff]   ;;  %v2764_v41 = vld [vmem:[%s3384_s4 + $0x1b8] sm:$0xff]  }
 0x817   :  { %v2723_v14 = vld [vmem:[%s3384_s4 + $0xa8] sm:$0xff]   ;;  %v1230_v6 = vcombine.high %v3131_v47, %v3131_v47  ;;  %v1950_v47 = vld [vmem:[%s3385_s5 + $0xd0] sm:$0xff] }
 0x818   :  { %v920_v50 = vsub.f32 %v918_v42, %v919_v46 }
 0x81a   :  { %v921_v51 = vmax.f32 %v920_v50, 0.0 }
 0x81c   :  { %v924_v52 = vadd.f32 1e-05, %v921_v51 }
 0x81e   :  { %2770 = vrsqrt.f32 %v924_v52 }
 0x81f   :  { %v2371_v42 = vpop.f32.mrb[8].mxu1 }
 0x820   :  { %v2372_v46 = vpop.f32.mrb[9].mxu1 }
 0x828   :  { %v2771_v54 = vpop.eup %2770 }
 0x829   :  { %v926_v55 = vmul.f32 %v2771_v54, %v922_v48  ;;  %v927_v56 = vmul.f32 %v2771_v54, %v923_v49  ;;  %v2373_v48 = vadd.f32 %v2372_v46, %v2371_v42  ;;  %v2374_v49 = vpop.f32.mrb[10].mxu1  ;;  %v2113_v42 = vrot.slane %v3002_v45, %v628_v23 }
 0x82a   :  { %v2375_v50 = vpop.f32.mrb[11].mxu1 }
 0x82b   :  { %v932_v57 = vmul.f32 %v931_v53, %v926_v55  ;;  %v933_v58 = vmul.f32 %v931_v53, %v927_v56  ;;  %v1951_v55 = vld [vmem:[%s3385_s5 + $0xd8] sm:$0xff] }
 0x82d   :  { %v938_v59 = vadd.f32 %v937_v18, %v932_v57  ;;  %v939_v60 = vadd.f32 %v937_v18, %v933_v58  ;;  %v2663_v57 = vpack.c.bf16 %v1951_v55, %v1950_v47 }
 0x82f   :  { %v940_v61 = vadd.f32 %v938_v59, %v2987_v25  ;;  %v941_v62 = vadd.f32 %v2985_v26, %v939_v60  ;;  %v2705_v26 = vld [vmem:[%s3384_s4 + $0xc8] sm:$0xff]  }
 0x830   :  { %v2707_v25 = vld [vmem:[%s3384_s4 + $0x88] sm:$0xff]  }
 0x831   :  { %v2660_v63 = vpack.c.bf16 %v941_v62, %v940_v61  ;;  %v1952_v62 = vld [vmem:[%s3385_s5 + $0xe0] sm:$0xff] }
 0x833   :  { %2661 = vmatpush3.bf16.msra.mxu0 %v2660_v63 }
 0x834   :  { %2377 = vmatprep.subr.bf16.mxu0 %v2701_v1  ;;  %v1953_v1 = vld [vmem:[%s3385_s5 + $0xe8] sm:$0xff] }
 0x835   :  { %v2666_v63 = vpack.c.bf16 %v1953_v1, %v1952_v62 }
 0x836   :  { %2568 = vmatmul.mubr.msk.f32.vlgmr.msra.gmra.mrb[10].mxu0 %vm31_vm0, %v942_v0 }
 0x837   :  { %2378 = vmatpush3.bf16.msra.mxu0 %v2703_v3  ;;  %1817 = vmatprep.mubr.bf16.mxu0 %v1231_v4  ;;  %v1181_v4 = vrot.slane %v3002_v45, %v419_v31  ;;  %v1947_v31 = vld [vmem:[%s3385_s5 + $0xb8] sm:$0xff] }
 0x838   :  { %2379 = vmatprep.subr.bf16.mxu0 %v2705_v26 }
 0x83b   :  { %2380 = vmatpush3.bf16.msra.mxu0 %v2707_v25 }
 0x83c   :  { %2381 = vmatprep.subr.bf16.mxu0 %v2709_v5  ;;  %v1780_v5 = vadd.f32 %v2373_v48, %v1181_v4 }
 0x83f   :  { %2382 = vmatpush3.bf16.msra.mxu0 %v2711_v16  ;;  %v2415_v51 = vpop.f32.mrb[12].mxu1 }
 0x840   :  { %2383 = vmatprep.subr.bf16.mxu0 %v2713_v7  ;;  %v2416_v52 = vpop.f32.mrb[13].mxu1 }
 0x841   :  { %v2418_v53 = vpop.f32.mrb[14].mxu1  ;;  %v2417_v18 = vadd.f32 %v2416_v52, %v2415_v51 }
 0x842   :  { %v2419_v54 = vpop.f32.mrb[15].mxu1 }
 0x843   :  { %2384 = vmatpush3.bf16.msra.mxu0 %v2715_v8 }
 0x844   :  { %2385 = vmatprep.subr.bf16.mxu0 %v2717_v9 }
 0x847   :  { %2386 = vmatpush3.bf16.msra.mxu0 %v2719_v12 }
 0x848   :  { %2387 = vmatprep.subr.bf16.mxu0 %v2721_v13 }
 0x84b   :  { %2388 = vmatpush3.bf16.msra.mxu0 %v2723_v14 }
 0x84c   :  { %2389 = vmatprep.subr.bf16.mxu0 %v2725_v15 }
 0x84f   :  { %2390 = vmatpush3.bf16.msra.mxu0 %v2727_v20 }
 0x850   :  { %2391 = vmatprep.subr.bf16.mxu0 %v2729_v24 }
 0x853   :  { %2392 = vmatpush3.bf16.msra.mxu0 %v2731_v28 }
 0x854   :  { %2421 = vmatprep.subr.bf16.mxu0 %v2734_v11  ;;  %v1946_v11 = vld [vmem:[%s3385_s5 + $0xb0] sm:$0xff] }
 0x856   :  { %1818 = vmatmul.mubr.bf16.vlgmr.msra.gmra.mrb[12].mxu0 %v1229_v29 }
 0x857   :  { %2422 = vmatpush3.bf16.msra.mxu0 %v2736_v30  ;;  %1897 = vmatprep.mubr.bf16.mxu0 %v1232_v32  ;;  %v2669_v30 = vpack.c.bf16 %v1947_v31, %v1946_v11 }
 0x858   :  { %2423 = vmatprep.subr.bf16.mxu0 %v2738_v33  ;;  %v1948_v33 = vld [vmem:[%s3385_s5 + $0xc0] sm:$0xff] }
 0x85b   :  { %2424 = vmatpush3.bf16.msra.mxu0 %v2740_v27  ;;  %v1949_v27 = vld [vmem:[%s3385_s5 + $0xc8] sm:$0xff] }
 0x85c   :  { %2425 = vmatprep.subr.bf16.mxu0 %v2742_v22  ;;  %v2672_v22 = vpack.c.bf16 %v1949_v27, %v1948_v33 }
 0x85f   :  { %2426 = vmatpush3.bf16.msra.mxu0 %v2744_v43  ;;  %v2459_v56 = vpop.f32.mrb[16].mxu1  ;;  %v2106_v43 = vld [vmem:[%s3385_s5 + $0xf0] sm:$0xff] }
 0x860   :  { %2427 = vmatprep.subr.bf16.mxu0 %v2746_v34  ;;  %v2460_v58 = vpop.f32.mrb[17].mxu1  ;;  %v2107_v34 = vld [vmem:[%s3385_s5 + $0xf8] sm:$0xff] }
 0x861   :  { %v2462_v59 = vpop.f32.mrb[18].mxu1  ;;  %v2461_v60 = vadd.f32 %v2460_v58, %v2459_v56 }
 0x862   :  { %v2463_v61 = vpop.f32.mrb[19].mxu1 }
 0x863   :  { %2428 = vmatpush3.bf16.msra.mxu0 %v2748_v2  ;;  %v2675_v2 = vpack.c.bf16 %v2107_v34, %v2106_v43 }
 0x864   :  { %2429 = vmatprep.subr.bf16.mxu0 %v2750_v35  ;;  %v2108_v35 = vld [vmem:[%s3385_s5 + $0x100] sm:$0xff] }
 0x867   :  { %2430 = vmatpush3.bf16.msra.mxu0 %v2752_v36 }
 0x868   :  { %2431 = vmatprep.subr.bf16.mxu0 %v2754_v37 }
 0x86b   :  { %2432 = vmatpush3.bf16.msra.mxu0 %v2756_v38 }
 0x86c   :  { %2433 = vmatprep.subr.bf16.mxu0 %v2758_v39  ;;  %v2103_v39 = vrot.slane %v3002_v45, %v510_v44 }
 0x86f   :  { %2434 = vmatpush3.bf16.msra.mxu0 %v2760_v40 }
 0x870   :  { %2435 = vmatprep.subr.bf16.mxu0 %v2762_v19 }
 0x873   :  { %2436 = vmatpush3.bf16.msra.mxu0 %v2764_v41 }
 0x874   :  { %2662 = vmatprep.subr.bf16.mxu0 %v2797_v10 }
 0x876   :  { %1898 = vmatmul.mubr.bf16.vlgmr.msra.gmra.mrb[16].mxu0 %v1230_v6 }
 0x877   :  { %2578 = vmatprep.mubr.msk.f32.mxu0 %vm2798_vm2, %v2799_v21  ;;  %2664 = vmatpush3.bf16.msra.mxu0 %v2663_v57 }
 0x878   :  { %2665 = vmatprep.subr.bf16.mxu0 %v2797_v10 }
 0x87b   :  { %2667 = vmatpush3.bf16.msra.mxu0 %v2666_v63 }
 0x87c   :  { %2668 = vmatprep.subr.bf16.mxu0 %v2797_v10 }
 0x909   :  { %v1012_v0 = vpop.f32.mrb[10].mxu0 }
 0x90a   :  { %v2569_v3 = vpop.f32.mrb[11].mxu0 }
 0x929   :  { %v2393_v26 = vpop.f32.mrb[12].mxu0 }
 0x92a   :  { %v2394_v25 = vpop.f32.mrb[13].mxu0 }
 0x92b   :  { %v2395_v16 = vadd.f32 %v2394_v25, %v2393_v26  ;;  %v2396_v7 = vpop.f32.mrb[14].mxu0 }
 0x92c   :  { %v2397_v8 = vpop.f32.mrb[15].mxu0 }
 0x92d   :  { %v1820_v9 = vadd.f32 %v2395_v16, %v1780_v5 }
 0x92f   :  { %v1860_v12 = vadd.f32 %v2417_v18, %v1820_v9 }
 0x949   :  { %v2437_v13 = vpop.f32.mrb[16].mxu0 }
 0x94a   :  { %v2438_v14 = vpop.f32.mrb[17].mxu0 }
 0x94b   :  { %v2439_v15 = vadd.f32 %v2438_v14, %v2437_v13  ;;  %v2440_v20 = vpop.f32.mrb[18].mxu0 }
 0x94c   :  { %v2441_v24 = vpop.f32.mrb[19].mxu0 }
 0x94d   :  { %v1900_v28 = vadd.f32 %v2439_v15, %v1860_v12 }
 0x94f   :  { %v1940_v29 = vadd.f32 %v2461_v60, %v1900_v28 }
 0x951   :  { %v1945_v32 = vmax.f32 %v1940_v29, 0.0 }
 0x953   :  { %2579 = vmatmul.mubr.msk.f32.vlgmr.msra.gmra.mrb[20].mxu0 %vm210_vm1, %v1945_v32 }
 0x954   :  { %2670 = vmatpush3.bf16.msra.mxu0 %v2669_v30  ;;  %2589 = vmatprep.mubr.msk.f32.mxu0 %vm2798_vm2, %v2799_v21 }
 0x955   :  { %2671 = vmatprep.subr.bf16.mxu0 %v2797_v10 }
 0x958   :  { %2673 = vmatpush3.bf16.msra.mxu0 %v2672_v22 }
 0x959   :  { %2674 = vmatprep.subr.bf16.mxu0 %v2797_v10 }
 0x95b   :  { %2590 = vmatmul.mubr.msk.f32.vlgmr.msra.gmra.mrb[22].mxu0 %vm210_vm1, %v1012_v0 }
 0x95c   :  { %2600 = vmatprep.mubr.msk.f32.mxu0 %vm2798_vm2, %v2799_v21  ;;  %2676 = vmatpush3.bf16.msra.mxu0 %v2675_v2  ;;  %v2109_v21 = vld [vmem:[%s3385_s5 + $0x108] sm:$0xff]  ;;  %s2800_s5 = smov [#allocation2]  }
 0x95d   :  { %2677 = vmatprep.subr.bf16.mxu0 %v2797_v10  ;;  %v2678_v36 = vpack.c.bf16 %v2109_v21, %v2108_v35  ;;  %s2195_s25 = sshll.u32 %s2800_s5, 4  ;;  %s2196_s25 = int_to_ptr.vmem [resolvable:$true] %s2195_s25 }
 0x95e   :  { %s2772_s26 = scalar_lea.vmem %s2196_s25, 32  ;;  %p2777_p1 = scmp.lt.s32.totalorder %s2196_s25, %s2196_s25 }
 0x95f   :  { %p2773_p0 = scmp.ne.s32.totalorder %s2196_s25, %s2772_s26  ;;  %p2778_p2 = scmp.lt.s32.totalorder %s2772_s26, %s2772_s26 }
 0x960   :  { %2679 = vmatpush3.bf16.msra.mxu0 %v2678_v36 }
 0x961   :  { %p2779_p3 = por %p2778_p2, %p2777_p1 }
 0x963   :  { %p2780_p4 = pnand %p2779_p3, %p2773_p0 }
 0xa26   :  { %v2023_v37 = vpop.f32.mrb[20].mxu0 }
 0xa27   :  { %v2580_v38 = vpop.f32.mrb[21].mxu0 }
 0xa2e   :  { %v2096_v40 = vpop.f32.mrb[22].mxu0 }
 0xa2f   :  { %v2097_v19 = vadd.f32 %v2096_v40, %v2023_v37  ;;  %v2591_v41 = vpop.f32.mrb[23].mxu0 }
 0xa31   :  { %v2104_v10 = vadd.f32 %v2103_v39, %v2097_v19 }
 0xa33   :  { %v2105_v6 = vmax.f32 %v2104_v10, 0.0 }
 0xa35   :  { %2601 = vmatmul.mubr.msk.f32.vlgmr.msra.gmra.mrb[24].mxu0 %vm210_vm1, %v2105_v6 }
 0xb08   :  { %v2183_v46 = vpop.f32.mrb[24].mxu0 }
 0xb09   :  { %v2184_v48 = vadd.f32 %v2183_v46, %v2113_v42  ;;  %v2602_v49 = vpop.f32.mrb[25].mxu0 }
 0xb0b   :  { %2188 = vst.msk [vmem:[#allocation2] sm:$0x3] %vm2187_vm3, %v2184_v48 }
 0xb0c   :  { %2783 = shalt.err (!%p2780_p4)
}
 0xb0d   :  { %s2784_s29 = scalar_lea.hbm %s3386_s6, 32 }
 0xb0e   :  { %p2785_p5 = scmp.ne.s32.totalorder %s3386_s6, %s2784_s29  ;;  %p2788_p6 = scmp.lt.u32.totalorder %s2784_s29, %s3386_s6 }
 0xb10   :  { %p2790_p7 = pnand %p2788_p6, %p2785_p5 }
 0xb12   :  { %2793 = shalt.err (!%p2790_p7)
}
 0xb13   :  { %2198 = dma.vmem_to_hbm [thread:$0]  %s2196_s25, 32, %s3386_s6, [#allocation3]  }
 0xb14   :  { %2794 = dma.done.wait [#allocation3], 32  }
 0xb15   :  { %2795 = vsyncadd [#allocation3], 4294967264 }
 0xb16   :  { %2202 = vsyncpa [#allocation3], 1 }

</bundles_post_ra>
